<compile_context>
chip_gen: v7x
topology: tpu7x:2x2x1
jax: 0.10.0
libtpu: 0.0.40
codegen_flags: <defaults>
</compile_context>

<pallas_src>
import functools

import jax
import jax.numpy as jnp
import numpy as np
from jax import lax
from jax.experimental import pallas as pl
from jax.experimental.pallas import tpu as pltpu


# ---------------------------------------------------------------------------
# Pallas kernel: one (direction, time-block) grid cell of a bidirectional layer.
# gx_ref : (T_blk, B, 4H)  precomputed x@W_ih + b for this direction / time block
# whh_ref: (H, 4H)         recurrent weights for this direction
# out_ref: (T_blk, B, H)   hidden outputs for this direction / time block
# h_scr/c_scr: (B, H)      recurrent state, persists across time blocks
# ---------------------------------------------------------------------------
def _bilstm_layer_kernel(gx_ref, whh_ref, out_ref, h_scr, c_scr, *,
                         hidden_size, t_block, apply_relu):
    H = hidden_size
    d = pl.program_id(0)    # 0 = forward, 1 = backward
    tb = pl.program_id(1)   # time block (index_map already orders blocks per direction)

    @pl.when(tb == 0)
    def _():
        h_scr[...] = jnp.zeros_like(h_scr)
        c_scr[...] = jnp.zeros_like(c_scr)

    # Hoisted: weight load + bf16 cast done once per time block, not per step.
    whh_bf = whh_ref[...].astype(jnp.bfloat16)

    def step(t, carry):
        h, c = carry
        # fwd: local index t ; bwd: local index t_block-1-t  (branch-free)
        t_loc = t + d * (t_block - 1 - 2 * t)
        gates = gx_ref[t_loc] + jnp.dot(h.astype(jnp.bfloat16), whh_bf,
                                        preferred_element_type=jnp.float32)   # (B, 4H)
        # Full-width activations on the (B, 4H) slab (2 EUP passes), then gate selects.
        sig = jax.nn.sigmoid(gates)
        th = jnp.tanh(gates)
        i_g = sig[:, 0:H]
        f_g = sig[:, H:2 * H]
        g_g = th[:, 2 * H:3 * H]
        o_g = sig[:, 3 * H:4 * H]
        c_new = f_g * c + i_g * g_g
        h_new = o_g * jnp.tanh(c_new)
        out_t = jnp.maximum(h_new, 0.0) if apply_relu else h_new
        out_ref[t_loc] = out_t
        return h_new, c_new

    h, c = lax.fori_loop(0, t_block, step, (h_scr[...], c_scr[...]), unroll=True)
    h_scr[...] = h
    c_scr[...] = c


def _run_bilstm_layer(gates_x, whh_stack, hidden_size, t_block, apply_relu):
    """gates_x: (2, T, B, 4H) f32; whh_stack: (2, H, 4H) f32 -> (2, T, B, H) f32."""
    _, T, B, four_h = gates_x.shape
    H = hidden_size
    assert four_h == 4 * H
    assert T % t_block == 0
    n_tb = T // t_block

    def tb_eff(d, tb):
        # forward: blocks in order 0..n_tb-1; backward: reversed block order
        return tb + d * (n_tb - 1 - 2 * tb)

    gx_map = lambda d, tb: (d, tb_eff(d, tb), 0, 0)
    whh_map = lambda d, tb: (d, 0, 0)
    out_map = lambda d, tb: (d, tb_eff(d, tb), 0, 0)

    kernel = functools.partial(_bilstm_layer_kernel,
                               hidden_size=H, t_block=t_block, apply_relu=apply_relu)

    # Explicit VMEM budget: double-buffered gx/out blocks + weights + scratch + headroom.
    block_bytes = 4 * (t_block * B * 4 * H + H * 4 * H + t_block * B * H + 2 * B * H)
    vmem_limit = int(min(max(6 * block_bytes + (1 << 20), 8 << 20), 64 << 20))

    return pl.pallas_call(
        kernel,
        out_shape=jax.ShapeDtypeStruct((2, T, B, H), jnp.float32),
        grid_spec=pltpu.PrefetchScalarGridSpec(
            num_scalar_prefetch=0,
            grid=(2, n_tb),
            in_specs=[pl.BlockSpec((None, t_block, B, 4 * H), gx_map),
                      pl.BlockSpec((None, H, 4 * H), whh_map)],
            out_specs=pl.BlockSpec((None, t_block, B, H), out_map),
            scratch_shapes=[pltpu.VMEM((B, H), jnp.float32),
                            pltpu.VMEM((B, H), jnp.float32)]),
        compiler_params=pltpu.CompilerParams(
            dimension_semantics=("parallel", "arbitrary"),
            vmem_limit_bytes=vmem_limit),
    )(gates_x, whh_stack)


# ---------------------------------------------------------------------------
# Parameter init (PyTorch-shaped, uniform(-1/sqrt(H), 1/sqrt(H)), bias = b_ih + b_hh),
# stacked over the two directions.
# ---------------------------------------------------------------------------
def init_bilstm_params(key, input_size, hidden_size, num_layers):
    params = []
    bound = 1.0 / np.sqrt(hidden_size)
    for layer in range(num_layers):
        d_in = input_size if layer == 0 else 2 * hidden_size
        key, k1, k2, k3, k4 = jax.random.split(key, 5)
        wih = jax.random.uniform(k1, (2, d_in, 4 * hidden_size), jnp.float32, -bound, bound)
        whh = jax.random.uniform(k2, (2, hidden_size, 4 * hidden_size), jnp.float32, -bound, bound)
        bih = jax.random.uniform(k3, (2, 4 * hidden_size), jnp.float32, -bound, bound)
        bhh = jax.random.uniform(k4, (2, 4 * hidden_size), jnp.float32, -bound, bound)
        params.append((wih, whh, bih + bhh))
    return params


# ---------------------------------------------------------------------------
# Forward pass: hoisted input projections in XLA, recurrence in the fused Pallas kernel.
# ---------------------------------------------------------------------------
def bilstm_forward(x, params, hidden_size, t_block=None):
    # x: (B, T, D) batch_first, like the PyTorch module.
    B, T, _ = x.shape
    H = hidden_size
    num_layers = len(params)
    if t_block is None:
        t_block = next(c for c in (32, 16, 8, 4, 2, 1) if T % c == 0)

    x_tm = jnp.transpose(x, (1, 0, 2))                                # (T, B, D)
    prev = None                                                       # (2, T, B, H)
    for layer, (wih, whh, b) in enumerate(params):
        last = layer == num_layers - 1                                # ReLU fused into last layer
        if layer == 0:
            gates_x = jnp.einsum('tbd,ndg->ntbg', x_tm, wih) + b[:, None, None, :]
        else:
            # Contract directly against the direction-major previous output: no concat needed.
            wih_split = wih.reshape(2, 2, H, 4 * H)                   # (cur dir, prev half, H, 4H)
            gates_x = jnp.einsum('ptbh,nphg->ntbg', prev, wih_split) + b[:, None, None, :]
        prev = _run_bilstm_layer(gates_x, whh, H, t_block, apply_relu=last)

    # (2, T, B, H) -> (B, T, 2H)  (single transpose at the end; fwd half first, as in PyTorch)
    return jnp.transpose(prev, (2, 1, 0, 3)).reshape(B, T, 2 * H)


# ---------------------------------------------------------------------------
# Pure-JAX reference (f32 lax.scan) for a correctness check.
# ---------------------------------------------------------------------------
def _lstm_dir_ref(x_tm, wih, whh, b, hidden_size):
    H = hidden_size
    B = x_tm.shape[1]

    def step(carry, x_t):
        h, c = carry
        gates = x_t @ wih + h @ whh + b
        i = jax.nn.sigmoid(gates[:, 0:H])
        f = jax.nn.sigmoid(gates[:, H:2 * H])
        g = jnp.tanh(gates[:, 2 * H:3 * H])
        o = jax.nn.sigmoid(gates[:, 3 * H:4 * H])
        c = f * c + i * g
        h = o * jnp.tanh(c)
        return (h, c), h

    init = (jnp.zeros((B, H), jnp.float32), jnp.zeros((B, H), jnp.float32))
    _, hs = lax.scan(step, init, x_tm)
    return hs


def bilstm_reference(x, params, hidden_size):
    x_tm = jnp.transpose(x, (1, 0, 2))
    for (wih, whh, b) in params:
        h_f = _lstm_dir_ref(x_tm, wih[0], whh[0], b[0], hidden_size)
        h_b = jnp.flip(_lstm_dir_ref(jnp.flip(x_tm, 0), wih[1], whh[1], b[1], hidden_size), 0)
        x_tm = jnp.concatenate([h_f, h_b], axis=-1)
    return jnp.maximum(jnp.transpose(x_tm, (1, 0, 2)), 0.0)


if __name__ == "__main__":
    # Module hyperparameters (small, consistent with the forward pass).
    input_size, hidden_size, num_layers, seq_length = 16, 32, 2, 8
    batch = 2

    key = jax.random.PRNGKey(0)
    kx, kp = jax.random.split(key)
    x = jax.random.normal(kx, (batch, seq_length, input_size), jnp.float32)
    params = init_bilstm_params(kp, input_size, hidden_size, num_layers)

    # t_block=4 so the test also exercises h/c carry across time blocks (grid axis 1).
    fwd = jax.jit(functools.partial(bilstm_forward, hidden_size=hidden_size, t_block=4))
    out = jax.block_until_ready(fwd(x, params))
    assert out.shape == (batch, seq_length, 2 * hidden_size)

    ref = bilstm_reference(x, params, hidden_size)
    # bf16 recurrent matmul (f32 accumulation) -> slightly looser tolerance vs f32 reference.
    np.testing.assert_allclose(np.asarray(out), np.asarray(ref), atol=2e-2, rtol=2e-2)

    print("KERNEL_OK")
</pallas_src>

<mosaic_0001>
module attributes {stable_mosaic.version = 11 : i64} {
  func.func @_bilstm_layer_kernel(%arg0: i32, %arg1: i32, %arg2: memref<1x4x2x128xf32, #tpu.memory_space<vmem>>, %arg3: memref<1x32x128xf32, #tpu.memory_space<vmem>>, %arg4: memref<1x4x2x32xf32, #tpu.memory_space<vmem>>, %arg5: memref<2x32xf32, #tpu.memory_space<vmem>>, %arg6: memref<2x32xf32, #tpu.memory_space<vmem>>) attributes {dimension_semantics = [#tpu.dimension_semantics<parallel>, #tpu.dimension_semantics<arbitrary>], iteration_bounds = array<i64: 2, 2>, scalar_prefetch = 0 : i64, scratch_operands = 2 : i64, tpu.core_type = #tpu.core_type<tc>, window_params = [{transform_indices = @transform_0, window_bounds = array<i64: 1, 4, 2, 128>}, {transform_indices = @transform_1, window_bounds = array<i64: 1, 32, 128>}, {transform_indices = @transform_2, window_bounds = array<i64: 1, 4, 2, 32>}]} {
    %c0_i32 = arith.constant 0 : i32
    %0 = arith.cmpi eq, %arg1, %c0_i32 : i32
    %1 = arith.extui %0 : i1 to i32
    %c0_i32_0 = arith.constant 0 : i32
    %2 = arith.cmpi ne, %1, %c0_i32_0 : i32
    scf.if %2 {
      %cst_51 = arith.constant 0.000000e+00 : f32
      %126 = vector.broadcast %cst_51 : f32 to vector<2x32xf32>
      %c0_52 = arith.constant 0 : index
      %c0_53 = arith.constant 0 : index
      %127 = vector.load %arg5[%c0_52, %c0_53] : memref<2x32xf32, #tpu.memory_space<vmem>>, vector<2x32xf32>
      tpu.vector_store %arg5[%c0_52, %c0_53], %126 {strides = array<i32>} : memref<2x32xf32, #tpu.memory_space<vmem>>, vector<2x32xf32>,
      %cst_54 = arith.constant 0.000000e+00 : f32
      %128 = vector.broadcast %cst_54 : f32 to vector<2x32xf32>
      %c0_55 = arith.constant 0 : index
      %c0_56 = arith.constant 0 : index
      %129 = vector.load %arg6[%c0_55, %c0_56] : memref<2x32xf32, #tpu.memory_space<vmem>>, vector<2x32xf32>
      tpu.vector_store %arg6[%c0_55, %c0_56], %128 {strides = array<i32>} : memref<2x32xf32, #tpu.memory_space<vmem>>, vector<2x32xf32>,
    } else {
    }
    %c0 = arith.constant 0 : index
    %c0_1 = arith.constant 0 : index
    %c0_2 = arith.constant 0 : index
    %3 = vector.load %arg3[%c0, %c0_1, %c0_2] : memref<1x32x128xf32, #tpu.memory_space<vmem>>, vector<1x32x128xf32>
    %4 = vector.shape_cast %3 : vector<1x32x128xf32> to vector<32x128xf32>
    %5 = arith.truncf %4 : vector<32x128xf32> to vector<32x128xbf16>
    %c0_3 = arith.constant 0 : index
    %c0_4 = arith.constant 0 : index
    %6 = vector.load %arg5[%c0_3, %c0_4] : memref<2x32xf32, #tpu.memory_space<vmem>>, vector<2x32xf32>
    %c0_5 = arith.constant 0 : index
    %c0_6 = arith.constant 0 : index
    %7 = vector.load %arg6[%c0_5, %c0_6] : memref<2x32xf32, #tpu.memory_space<vmem>>, vector<2x32xf32>
    %c0_i32_7 = arith.constant 0 : i32
    %c2_i32 = arith.constant 2 : i32
    %8 = arith.muli %c2_i32, %c0_i32_7 : i32
    %c3_i32 = arith.constant 3 : i32
    %9 = arith.subi %c3_i32, %8 : i32
    %10 = arith.muli %arg0, %9 : i32
    %11 = arith.addi %c0_i32_7, %10 : i32
    %c0_8 = arith.constant 0 : index
    %12 = arith.index_cast %11 : i32 to index
    %c0_9 = arith.constant 0 : index
    %c0_10 = arith.constant 0 : index
    %13 = vector.load %arg2[%c0_8, %12, %c0_9, %c0_10] : memref<1x4x2x128xf32, #tpu.memory_space<vmem>>, vector<1x1x2x128xf32>
    %14 = vector.shape_cast %13 : vector<1x1x2x128xf32> to vector<2x128xf32>
    %15 = arith.truncf %6 : vector<2x32xf32> to vector<2x32xbf16>
    %cst = arith.constant dense<0.000000e+00> : vector<2x128xf32>
    %16 = tpu.matmul %15, %5, %cst {dimension_numbers = #tpu.dot_dimension_numbers<[1], [0], [0], [1], [0, 0, 1, 1], [], []>} : vector<2x32xbf16>, vector<32x128xbf16>, vector<2x128xf32> -> vector<2x128xf32>
    %17 = arith.addf %14, %16 : vector<2x128xf32>
    %18 = arith.negf %17 : vector<2x128xf32>
    %19 = math.exp %18 : vector<2x128xf32>
    %cst_11 = arith.constant 1.000000e+00 : f32
    %20 = vector.broadcast %cst_11 : f32 to vector<2x128xf32>
    %21 = arith.addf %20, %19 : vector<2x128xf32>
    %22 = arith.divf %20, %21 : vector<2x128xf32>
    %23 = math.tanh %17 : vector<2x128xf32>
    %24 = vector.extract_strided_slice %22 {offsets = [0, 0], sizes = [2, 32], strides = [1, 1]} : vector<2x128xf32> to vector<2x32xf32>
    %25 = vector.extract_strided_slice %22 {offsets = [0, 32], sizes = [2, 32], strides = [1, 1]} : vector<2x128xf32> to vector<2x32xf32>
    %26 = vector.extract_strided_slice %23 {offsets = [0, 64], sizes = [2, 32], strides = [1, 1]} : vector<2x128xf32> to vector<2x32xf32>
    %27 = vector.extract_strided_slice %22 {offsets = [0, 96], sizes = [2, 32], strides = [1, 1]} : vector<2x128xf32> to vector<2x32xf32>
    %28 = arith.mulf %25, %7 : vector<2x32xf32>
    %29 = arith.mulf %24, %26 : vector<2x32xf32>
    %30 = arith.addf %28, %29 : vector<2x32xf32>
    %31 = math.tanh %30 : vector<2x32xf32>
    %32 = arith.mulf %27, %31 : vector<2x32xf32>
    %c0_12 = arith.constant 0 : index
    %33 = arith.index_cast %11 : i32 to index
    %c0_13 = arith.constant 0 : index
    %c0_14 = arith.constant 0 : index
    %34 = vector.load %arg4[%c0_12, %33, %c0_13, %c0_14] : memref<1x4x2x32xf32, #tpu.memory_space<vmem>>, vector<1x1x2x32xf32>
    %35 = vector.shape_cast %34 : vector<1x1x2x32xf32> to vector<2x32xf32>
    %36 = vector.shape_cast %32 : vector<2x32xf32> to vector<1x1x2x32xf32>
    tpu.vector_store %arg4[%c0_12, %33, %c0_13, %c0_14], %36 {strides = array<i32>} : memref<1x4x2x32xf32, #tpu.memory_space<vmem>>, vector<1x1x2x32xf32>,
    %c1_i32 = arith.constant 1 : i32
    %c2_i32_15 = arith.constant 2 : i32
    %37 = arith.muli %c2_i32_15, %c1_i32 : i32
    %c3_i32_16 = arith.constant 3 : i32
    %38 = arith.subi %c3_i32_16, %37 : i32
    %39 = arith.muli %arg0, %38 : i32
    %40 = arith.addi %c1_i32, %39 : i32
    %c0_17 = arith.constant 0 : index
    %41 = arith.index_cast %40 : i32 to index
    %c0_18 = arith.constant 0 : index
    %c0_19 = arith.constant 0 : index
    %42 = vector.load %arg2[%c0_17, %41, %c0_18, %c0_19] : memref<1x4x2x128xf32, #tpu.memory_space<vmem>>, vector<1x1x2x128xf32>
    %43 = vector.shape_cast %42 : vector<1x1x2x128xf32> to vector<2x128xf32>
    %44 = arith.truncf %32 : vector<2x32xf32> to vector<2x32xbf16>
    %cst_20 = arith.constant dense<0.000000e+00> : vector<2x128xf32>
    %45 = tpu.matmul %44, %5, %cst_20 {dimension_numbers = #tpu.dot_dimension_numbers<[1], [0], [0], [1], [0, 0, 1, 1], [], []>} : vector<2x32xbf16>, vector<32x128xbf16>, vector<2x128xf32> -> vector<2x128xf32>
    %46 = arith.addf %43, %45 : vector<2x128xf32>
    %47 = arith.negf %46 : vector<2x128xf32>
    %48 = math.exp %47 : vector<2x128xf32>
    %cst_21 = arith.constant 1.000000e+00 : f32
    %49 = vector.broadcast %cst_21 : f32 to vector<2x128xf32>
    %50 = arith.addf %49, %48 : vector<2x128xf32>
    %51 = arith.divf %49, %50 : vector<2x128xf32>
    %52 = math.tanh %46 : vector<2x128xf32>
    %53 = vector.extract_strided_slice %51 {offsets = [0, 0], sizes = [2, 32], strides = [1, 1]} : vector<2x128xf32> to vector<2x32xf32>
    %54 = vector.extract_strided_slice %51 {offsets = [0, 32], sizes = [2, 32], strides = [1, 1]} : vector<2x128xf32> to vector<2x32xf32>
    %55 = vector.extract_strided_slice %52 {offsets = [0, 64], sizes = [2, 32], strides = [1, 1]} : vector<2x128xf32> to vector<2x32xf32>
    %56 = vector.extract_strided_slice %51 {offsets = [0, 96], sizes = [2, 32], strides = [1, 1]} : vector<2x128xf32> to vector<2x32xf32>
    %57 = arith.mulf %54, %30 : vector<2x32xf32>
    %58 = arith.mulf %53, %55 : vector<2x32xf32>
    %59 = arith.addf %57, %58 : vector<2x32xf32>
    %60 = math.tanh %59 : vector<2x32xf32>
    %61 = arith.mulf %56, %60 : vector<2x32xf32>
    %c0_22 = arith.constant 0 : index
    %62 = arith.index_cast %40 : i32 to index
    %c0_23 = arith.constant 0 : index
    %c0_24 = arith.constant 0 : index
    %63 = vector.load %arg4[%c0_22, %62, %c0_23, %c0_24] : memref<1x4x2x32xf32, #tpu.memory_space<vmem>>, vector<1x1x2x32xf32>
    %64 = vector.shape_cast %63 : vector<1x1x2x32xf32> to vector<2x32xf32>
    %65 = vector.shape_cast %61 : vector<2x32xf32> to vector<1x1x2x32xf32>
    tpu.vector_store %arg4[%c0_22, %62, %c0_23, %c0_24], %65 {strides = array<i32>} : memref<1x4x2x32xf32, #tpu.memory_space<vmem>>, vector<1x1x2x32xf32>,
    %c2_i32_25 = arith.constant 2 : i32
    %c2_i32_26 = arith.constant 2 : i32
    %66 = arith.muli %c2_i32_26, %c2_i32_25 : i32
    %c3_i32_27 = arith.constant 3 : i32
    %67 = arith.subi %c3_i32_27, %66 : i32
    %68 = arith.muli %arg0, %67 : i32
    %69 = arith.addi %c2_i32_25, %68 : i32
    %c0_28 = arith.constant 0 : index
    %70 = arith.index_cast %69 : i32 to index
    %c0_29 = arith.constant 0 : index
    %c0_30 = arith.constant 0 : index
    %71 = vector.load %arg2[%c0_28, %70, %c0_29, %c0_30] : memref<1x4x2x128xf32, #tpu.memory_space<vmem>>, vector<1x1x2x128xf32>
    %72 = vector.shape_cast %71 : vector<1x1x2x128xf32> to vector<2x128xf32>
    %73 = arith.truncf %61 : vector<2x32xf32> to vector<2x32xbf16>
    %cst_31 = arith.constant dense<0.000000e+00> : vector<2x128xf32>
    %74 = tpu.matmul %73, %5, %cst_31 {dimension_numbers = #tpu.dot_dimension_numbers<[1], [0], [0], [1], [0, 0, 1, 1], [], []>} : vector<2x32xbf16>, vector<32x128xbf16>, vector<2x128xf32> -> vector<2x128xf32>
    %75 = arith.addf %72, %74 : vector<2x128xf32>
    %76 = arith.negf %75 : vector<2x128xf32>
    %77 = math.exp %76 : vector<2x128xf32>
    %cst_32 = arith.constant 1.000000e+00 : f32
    %78 = vector.broadcast %cst_32 : f32 to vector<2x128xf32>
    %79 = arith.addf %78, %77 : vector<2x128xf32>
    %80 = arith.divf %78, %79 : vector<2x128xf32>
    %81 = math.tanh %75 : vector<2x128xf32>
    %82 = vector.extract_strided_slice %80 {offsets = [0, 0], sizes = [2, 32], strides = [1, 1]} : vector<2x128xf32> to vector<2x32xf32>
    %83 = vector.extract_strided_slice %80 {offsets = [0, 32], sizes = [2, 32], strides = [1, 1]} : vector<2x128xf32> to vector<2x32xf32>
    %84 = vector.extract_strided_slice %81 {offsets = [0, 64], sizes = [2, 32], strides = [1, 1]} : vector<2x128xf32> to vector<2x32xf32>
    %85 = vector.extract_strided_slice %80 {offsets = [0, 96], sizes = [2, 32], strides = [1, 1]} : vector<2x128xf32> to vector<2x32xf32>
    %86 = arith.mulf %83, %59 : vector<2x32xf32>
    %87 = arith.mulf %82, %84 : vector<2x32xf32>
    %88 = arith.addf %86, %87 : vector<2x32xf32>
    %89 = math.tanh %88 : vector<2x32xf32>
    %90 = arith.mulf %85, %89 : vector<2x32xf32>
    %c0_33 = arith.constant 0 : index
    %91 = arith.index_cast %69 : i32 to index
    %c0_34 = arith.constant 0 : index
    %c0_35 = arith.constant 0 : index
    %92 = vector.load %arg4[%c0_33, %91, %c0_34, %c0_35] : memref<1x4x2x32xf32, #tpu.memory_space<vmem>>, vector<1x1x2x32xf32>
    %93 = vector.shape_cast %92 : vector<1x1x2x32xf32> to vector<2x32xf32>
    %94 = vector.shape_cast %90 : vector<2x32xf32> to vector<1x1x2x32xf32>
    tpu.vector_store %arg4[%c0_33, %91, %c0_34, %c0_35], %94 {strides = array<i32>} : memref<1x4x2x32xf32, #tpu.memory_space<vmem>>, vector<1x1x2x32xf32>,
    %c3_i32_36 = arith.constant 3 : i32
    %c2_i32_37 = arith.constant 2 : i32
    %95 = arith.muli %c2_i32_37, %c3_i32_36 : i32
    %c3_i32_38 = arith.constant 3 : i32
    %96 = arith.subi %c3_i32_38, %95 : i32
    %97 = arith.muli %arg0, %96 : i32
    %98 = arith.addi %c3_i32_36, %97 : i32
    %c0_39 = arith.constant 0 : index
    %99 = arith.index_cast %98 : i32 to index
    %c0_40 = arith.constant 0 : index
    %c0_41 = arith.constant 0 : index
    %100 = vector.load %arg2[%c0_39, %99, %c0_40, %c0_41] : memref<1x4x2x128xf32, #tpu.memory_space<vmem>>, vector<1x1x2x128xf32>
    %101 = vector.shape_cast %100 : vector<1x1x2x128xf32> to vector<2x128xf32>
    %102 = arith.truncf %90 : vector<2x32xf32> to vector<2x32xbf16>
    %cst_42 = arith.constant dense<0.000000e+00> : vector<2x128xf32>
    %103 = tpu.matmul %102, %5, %cst_42 {dimension_numbers = #tpu.dot_dimension_numbers<[1], [0], [0], [1], [0, 0, 1, 1], [], []>} : vector<2x32xbf16>, vector<32x128xbf16>, vector<2x128xf32> -> vector<2x128xf32>
    %104 = arith.addf %101, %103 : vector<2x128xf32>
    %105 = arith.negf %104 : vector<2x128xf32>
    %106 = math.exp %105 : vector<2x128xf32>
    %cst_43 = arith.constant 1.000000e+00 : f32
    %107 = vector.broadcast %cst_43 : f32 to vector<2x128xf32>
    %108 = arith.addf %107, %106 : vector<2x128xf32>
    %109 = arith.divf %107, %108 : vector<2x128xf32>
    %110 = math.tanh %104 : vector<2x128xf32>
    %111 = vector.extract_strided_slice %109 {offsets = [0, 0], sizes = [2, 32], strides = [1, 1]} : vector<2x128xf32> to vector<2x32xf32>
    %112 = vector.extract_strided_slice %109 {offsets = [0, 32], sizes = [2, 32], strides = [1, 1]} : vector<2x128xf32> to vector<2x32xf32>
    %113 = vector.extract_strided_slice %110 {offsets = [0, 64], sizes = [2, 32], strides = [1, 1]} : vector<2x128xf32> to vector<2x32xf32>
    %114 = vector.extract_strided_slice %109 {offsets = [0, 96], sizes = [2, 32], strides = [1, 1]} : vector<2x128xf32> to vector<2x32xf32>
    %115 = arith.mulf %112, %88 : vector<2x32xf32>
    %116 = arith.mulf %111, %113 : vector<2x32xf32>
    %117 = arith.addf %115, %116 : vector<2x32xf32>
    %118 = math.tanh %117 : vector<2x32xf32>
    %119 = arith.mulf %114, %118 : vector<2x32xf32>
    %c0_44 = arith.constant 0 : index
    %120 = arith.index_cast %98 : i32 to index
    %c0_45 = arith.constant 0 : index
    %c0_46 = arith.constant 0 : index
    %121 = vector.load %arg4[%c0_44, %120, %c0_45, %c0_46] : memref<1x4x2x32xf32, #tpu.memory_space<vmem>>, vector<1x1x2x32xf32>
    %122 = vector.shape_cast %121 : vector<1x1x2x32xf32> to vector<2x32xf32>
    %123 = vector.shape_cast %119 : vector<2x32xf32> to vector<1x1x2x32xf32>
    tpu.vector_store %arg4[%c0_44, %120, %c0_45, %c0_46], %123 {strides = array<i32>} : memref<1x4x2x32xf32, #tpu.memory_space<vmem>>, vector<1x1x2x32xf32>,
    %c4_i32 = arith.constant 4 : i32
    %c0_47 = arith.constant 0 : index
    %c0_48 = arith.constant 0 : index
    %124 = vector.load %arg5[%c0_47, %c0_48] : memref<2x32xf32, #tpu.memory_space<vmem>>, vector<2x32xf32>
    tpu.vector_store %arg5[%c0_47, %c0_48], %119 {strides = array<i32>} : memref<2x32xf32, #tpu.memory_space<vmem>>, vector<2x32xf32>,
    %c0_49 = arith.constant 0 : index
    %c0_50 = arith.constant 0 : index
    %125 = vector.load %arg6[%c0_49, %c0_50] : memref<2x32xf32, #tpu.memory_space<vmem>>, vector<2x32xf32>
    tpu.vector_store %arg6[%c0_49, %c0_50], %117 {strides = array<i32>} : memref<2x32xf32, #tpu.memory_space<vmem>>, vector<2x32xf32>,
    return
  }
  func.func @transform_0(%arg0: i32, %arg1: i32) -> (i32, i32, i32, i32) {
    %c2_i32 = arith.constant 2 : i32
    %0 = arith.muli %c2_i32, %arg1 : i32
    %c1_i32 = arith.constant 1 : i32
    %1 = arith.subi %c1_i32, %0 : i32
    %2 = arith.muli %arg0, %1 : i32
    %3 = arith.addi %arg1, %2 : i32
    %c0_i32 = arith.constant 0 : i32
    %c0_i32_0 = arith.constant 0 : i32
    %c0_i32_1 = arith.constant 0 : i32
    return %arg0, %3, %c0_i32, %c0_i32_0 : i32, i32, i32, i32
  }
  func.func @transform_1(%arg0: i32, %arg1: i32) -> (i32, i32, i32) {
    %c0_i32 = arith.constant 0 : i32
    %c0_i32_0 = arith.constant 0 : i32
    %c0_i32_1 = arith.constant 0 : i32
    return %arg0, %c0_i32, %c0_i32_0 : i32, i32, i32
  }
  func.func @transform_2(%arg0: i32, %arg1: i32) -> (i32, i32, i32, i32) {
    %c2_i32 = arith.constant 2 : i32
    %0 = arith.muli %c2_i32, %arg1 : i32
    %c1_i32 = arith.constant 1 : i32
    %1 = arith.subi %c1_i32, %0 : i32
    %2 = arith.muli %arg0, %1 : i32
    %3 = arith.addi %arg1, %2 : i32
    %c0_i32 = arith.constant 0 : i32
    %c0_i32_0 = arith.constant 0 : i32
    %c0_i32_1 = arith.constant 0 : i32
    return %arg0, %3, %c0_i32, %c0_i32_0 : i32, i32, i32, i32
  }
}

module attributes {stable_mosaic.version = 11 : i64} {
  func.func @_bilstm_layer_kernel(%arg0: i32, %arg1: i32, %arg2: memref<1x4x2x128xf32, #tpu.memory_space<vmem>>, %arg3: memref<1x32x128xf32, #tpu.memory_space<vmem>>, %arg4: memref<1x4x2x32xf32, #tpu.memory_space<vmem>>, %arg5: memref<2x32xf32, #tpu.memory_space<vmem>>, %arg6: memref<2x32xf32, #tpu.memory_space<vmem>>) attributes {dimension_semantics = [#tpu.dimension_semantics<parallel>, #tpu.dimension_semantics<arbitrary>], iteration_bounds = array<i64: 2, 2>, scalar_prefetch = 0 : i64, scratch_operands = 2 : i64, tpu.core_type = #tpu.core_type<tc>, window_params = [{transform_indices = @transform_0, window_bounds = array<i64: 1, 4, 2, 128>}, {transform_indices = @transform_1, window_bounds = array<i64: 1, 32, 128>}, {transform_indices = @transform_2, window_bounds = array<i64: 1, 4, 2, 32>}]} {
    %c0_i32 = arith.constant 0 : i32
    %0 = arith.cmpi eq, %arg1, %c0_i32 : i32
    %1 = arith.extui %0 : i1 to i32
    %c0_i32_0 = arith.constant 0 : i32
    %2 = arith.cmpi ne, %1, %c0_i32_0 : i32
    scf.if %2 {
      %cst_55 = arith.constant 0.000000e+00 : f32
      %134 = vector.broadcast %cst_55 : f32 to vector<2x32xf32>
      %c0_56 = arith.constant 0 : index
      %c0_57 = arith.constant 0 : index
      %135 = vector.load %arg5[%c0_56, %c0_57] : memref<2x32xf32, #tpu.memory_space<vmem>>, vector<2x32xf32>
      tpu.vector_store %arg5[%c0_56, %c0_57], %134 {strides = array<i32>} : memref<2x32xf32, #tpu.memory_space<vmem>>, vector<2x32xf32>,
      %cst_58 = arith.constant 0.000000e+00 : f32
      %136 = vector.broadcast %cst_58 : f32 to vector<2x32xf32>
      %c0_59 = arith.constant 0 : index
      %c0_60 = arith.constant 0 : index
      %137 = vector.load %arg6[%c0_59, %c0_60] : memref<2x32xf32, #tpu.memory_space<vmem>>, vector<2x32xf32>
      tpu.vector_store %arg6[%c0_59, %c0_60], %136 {strides = array<i32>} : memref<2x32xf32, #tpu.memory_space<vmem>>, vector<2x32xf32>,
    } else {
    }
    %c0 = arith.constant 0 : index
    %c0_1 = arith.constant 0 : index
    %c0_2 = arith.constant 0 : index
    %3 = vector.load %arg3[%c0, %c0_1, %c0_2] : memref<1x32x128xf32, #tpu.memory_space<vmem>>, vector<1x32x128xf32>
    %4 = vector.shape_cast %3 : vector<1x32x128xf32> to vector<32x128xf32>
    %5 = arith.truncf %4 : vector<32x128xf32> to vector<32x128xbf16>
    %c0_3 = arith.constant 0 : index
    %c0_4 = arith.constant 0 : index
    %6 = vector.load %arg5[%c0_3, %c0_4] : memref<2x32xf32, #tpu.memory_space<vmem>>, vector<2x32xf32>
    %c0_5 = arith.constant 0 : index
    %c0_6 = arith.constant 0 : index
    %7 = vector.load %arg6[%c0_5, %c0_6] : memref<2x32xf32, #tpu.memory_space<vmem>>, vector<2x32xf32>
    %c0_i32_7 = arith.constant 0 : i32
    %c2_i32 = arith.constant 2 : i32
    %8 = arith.muli %c2_i32, %c0_i32_7 : i32
    %c3_i32 = arith.constant 3 : i32
    %9 = arith.subi %c3_i32, %8 : i32
    %10 = arith.muli %arg0, %9 : i32
    %11 = arith.addi %c0_i32_7, %10 : i32
    %c0_8 = arith.constant 0 : index
    %12 = arith.index_cast %11 : i32 to index
    %c0_9 = arith.constant 0 : index
    %c0_10 = arith.constant 0 : index
    %13 = vector.load %arg2[%c0_8, %12, %c0_9, %c0_10] : memref<1x4x2x128xf32, #tpu.memory_space<vmem>>, vector<1x1x2x128xf32>
    %14 = vector.shape_cast %13 : vector<1x1x2x128xf32> to vector<2x128xf32>
    %15 = arith.truncf %6 : vector<2x32xf32> to vector<2x32xbf16>
    %cst = arith.constant dense<0.000000e+00> : vector<2x128xf32>
    %16 = tpu.matmul %15, %5, %cst {dimension_numbers = #tpu.dot_dimension_numbers<[1], [0], [0], [1], [0, 0, 1, 1], [], []>} : vector<2x32xbf16>, vector<32x128xbf16>, vector<2x128xf32> -> vector<2x128xf32>
    %17 = arith.addf %14, %16 : vector<2x128xf32>
    %18 = arith.negf %17 : vector<2x128xf32>
    %19 = math.exp %18 : vector<2x128xf32>
    %cst_11 = arith.constant 1.000000e+00 : f32
    %20 = vector.broadcast %cst_11 : f32 to vector<2x128xf32>
    %21 = arith.addf %20, %19 : vector<2x128xf32>
    %22 = arith.divf %20, %21 : vector<2x128xf32>
    %23 = math.tanh %17 : vector<2x128xf32>
    %24 = vector.extract_strided_slice %22 {offsets = [0, 0], sizes = [2, 32], strides = [1, 1]} : vector<2x128xf32> to vector<2x32xf32>
    %25 = vector.extract_strided_slice %22 {offsets = [0, 32], sizes = [2, 32], strides = [1, 1]} : vector<2x128xf32> to vector<2x32xf32>
    %26 = vector.extract_strided_slice %23 {offsets = [0, 64], sizes = [2, 32], strides = [1, 1]} : vector<2x128xf32> to vector<2x32xf32>
    %27 = vector.extract_strided_slice %22 {offsets = [0, 96], sizes = [2, 32], strides = [1, 1]} : vector<2x128xf32> to vector<2x32xf32>
    %28 = arith.mulf %25, %7 : vector<2x32xf32>
    %29 = arith.mulf %24, %26 : vector<2x32xf32>
    %30 = arith.addf %28, %29 : vector<2x32xf32>
    %31 = math.tanh %30 : vector<2x32xf32>
    %32 = arith.mulf %27, %31 : vector<2x32xf32>
    %cst_12 = arith.constant 0.000000e+00 : f32
    %33 = vector.broadcast %cst_12 : f32 to vector<2x32xf32>
    %34 = arith.maximumf %32, %33 : vector<2x32xf32>
    %c0_13 = arith.constant 0 : index
    %35 = arith.index_cast %11 : i32 to index
    %c0_14 = arith.constant 0 : index
    %c0_15 = arith.constant 0 : index
    %36 = vector.load %arg4[%c0_13, %35, %c0_14, %c0_15] : memref<1x4x2x32xf32, #tpu.memory_space<vmem>>, vector<1x1x2x32xf32>
    %37 = vector.shape_cast %36 : vector<1x1x2x32xf32> to vector<2x32xf32>
    %38 = vector.shape_cast %34 : vector<2x32xf32> to vector<1x1x2x32xf32>
    tpu.vector_store %arg4[%c0_13, %35, %c0_14, %c0_15], %38 {strides = array<i32>} : memref<1x4x2x32xf32, #tpu.memory_space<vmem>>, vector<1x1x2x32xf32>,
    %c1_i32 = arith.constant 1 : i32
    %c2_i32_16 = arith.constant 2 : i32
    %39 = arith.muli %c2_i32_16, %c1_i32 : i32
    %c3_i32_17 = arith.constant 3 : i32
    %40 = arith.subi %c3_i32_17, %39 : i32
    %41 = arith.muli %arg0, %40 : i32
    %42 = arith.addi %c1_i32, %41 : i32
    %c0_18 = arith.constant 0 : index
    %43 = arith.index_cast %42 : i32 to index
    %c0_19 = arith.constant 0 : index
    %c0_20 = arith.constant 0 : index
    %44 = vector.load %arg2[%c0_18, %43, %c0_19, %c0_20] : memref<1x4x2x128xf32, #tpu.memory_space<vmem>>, vector<1x1x2x128xf32>
    %45 = vector.shape_cast %44 : vector<1x1x2x128xf32> to vector<2x128xf32>
    %46 = arith.truncf %32 : vector<2x32xf32> to vector<2x32xbf16>
    %cst_21 = arith.constant dense<0.000000e+00> : vector<2x128xf32>
    %47 = tpu.matmul %46, %5, %cst_21 {dimension_numbers = #tpu.dot_dimension_numbers<[1], [0], [0], [1], [0, 0, 1, 1], [], []>} : vector<2x32xbf16>, vector<32x128xbf16>, vector<2x128xf32> -> vector<2x128xf32>
    %48 = arith.addf %45, %47 : vector<2x128xf32>
    %49 = arith.negf %48 : vector<2x128xf32>
    %50 = math.exp %49 : vector<2x128xf32>
    %cst_22 = arith.constant 1.000000e+00 : f32
    %51 = vector.broadcast %cst_22 : f32 to vector<2x128xf32>
    %52 = arith.addf %51, %50 : vector<2x128xf32>
    %53 = arith.divf %51, %52 : vector<2x128xf32>
    %54 = math.tanh %48 : vector<2x128xf32>
    %55 = vector.extract_strided_slice %53 {offsets = [0, 0], sizes = [2, 32], strides = [1, 1]} : vector<2x128xf32> to vector<2x32xf32>
    %56 = vector.extract_strided_slice %53 {offsets = [0, 32], sizes = [2, 32], strides = [1, 1]} : vector<2x128xf32> to vector<2x32xf32>
    %57 = vector.extract_strided_slice %54 {offsets = [0, 64], sizes = [2, 32], strides = [1, 1]} : vector<2x128xf32> to vector<2x32xf32>
    %58 = vector.extract_strided_slice %53 {offsets = [0, 96], sizes = [2, 32], strides = [1, 1]} : vector<2x128xf32> to vector<2x32xf32>
    %59 = arith.mulf %56, %30 : vector<2x32xf32>
    %60 = arith.mulf %55, %57 : vector<2x32xf32>
    %61 = arith.addf %59, %60 : vector<2x32xf32>
    %62 = math.tanh %61 : vector<2x32xf32>
    %63 = arith.mulf %58, %62 : vector<2x32xf32>
    %cst_23 = arith.constant 0.000000e+00 : f32
    %64 = vector.broadcast %cst_23 : f32 to vector<2x32xf32>
    %65 = arith.maximumf %63, %64 : vector<2x32xf32>
    %c0_24 = arith.constant 0 : index
    %66 = arith.index_cast %42 : i32 to index
    %c0_25 = arith.constant 0 : index
    %c0_26 = arith.constant 0 : index
    %67 = vector.load %arg4[%c0_24, %66, %c0_25, %c0_26] : memref<1x4x2x32xf32, #tpu.memory_space<vmem>>, vector<1x1x2x32xf32>
    %68 = vector.shape_cast %67 : vector<1x1x2x32xf32> to vector<2x32xf32>
    %69 = vector.shape_cast %65 : vector<2x32xf32> to vector<1x1x2x32xf32>
    tpu.vector_store %arg4[%c0_24, %66, %c0_25, %c0_26], %69 {strides = array<i32>} : memref<1x4x2x32xf32, #tpu.memory_space<vmem>>, vector<1x1x2x32xf32>,
    %c2_i32_27 = arith.constant 2 : i32
    %c2_i32_28 = arith.constant 2 : i32
    %70 = arith.muli %c2_i32_28, %c2_i32_27 : i32
    %c3_i32_29 = arith.constant 3 : i32
    %71 = arith.subi %c3_i32_29, %70 : i32
    %72 = arith.muli %arg0, %71 : i32
    %73 = arith.addi %c2_i32_27, %72 : i32
    %c0_30 = arith.constant 0 : index
    %74 = arith.index_cast %73 : i32 to index
    %c0_31 = arith.constant 0 : index
    %c0_32 = arith.constant 0 : index
    %75 = vector.load %arg2[%c0_30, %74, %c0_31, %c0_32] : memref<1x4x2x128xf32, #tpu.memory_space<vmem>>, vector<1x1x2x128xf32>
    %76 = vector.shape_cast %75 : vector<1x1x2x128xf32> to vector<2x128xf32>
    %77 = arith.truncf %63 : vector<2x32xf32> to vector<2x32xbf16>
    %cst_33 = arith.constant dense<0.000000e+00> : vector<2x128xf32>
    %78 = tpu.matmul %77, %5, %cst_33 {dimension_numbers = #tpu.dot_dimension_numbers<[1], [0], [0], [1], [0, 0, 1, 1], [], []>} : vector<2x32xbf16>, vector<32x128xbf16>, vector<2x128xf32> -> vector<2x128xf32>
    %79 = arith.addf %76, %78 : vector<2x128xf32>
    %80 = arith.negf %79 : vector<2x128xf32>
    %81 = math.exp %80 : vector<2x128xf32>
    %cst_34 = arith.constant 1.000000e+00 : f32
    %82 = vector.broadcast %cst_34 : f32 to vector<2x128xf32>
    %83 = arith.addf %82, %81 : vector<2x128xf32>
    %84 = arith.divf %82, %83 : vector<2x128xf32>
    %85 = math.tanh %79 : vector<2x128xf32>
    %86 = vector.extract_strided_slice %84 {offsets = [0, 0], sizes = [2, 32], strides = [1, 1]} : vector<2x128xf32> to vector<2x32xf32>
    %87 = vector.extract_strided_slice %84 {offsets = [0, 32], sizes = [2, 32], strides = [1, 1]} : vector<2x128xf32> to vector<2x32xf32>
    %88 = vector.extract_strided_slice %85 {offsets = [0, 64], sizes = [2, 32], strides = [1, 1]} : vector<2x128xf32> to vector<2x32xf32>
    %89 = vector.extract_strided_slice %84 {offsets = [0, 96], sizes = [2, 32], strides = [1, 1]} : vector<2x128xf32> to vector<2x32xf32>
    %90 = arith.mulf %87, %61 : vector<2x32xf32>
    %91 = arith.mulf %86, %88 : vector<2x32xf32>
    %92 = arith.addf %90, %91 : vector<2x32xf32>
    %93 = math.tanh %92 : vector<2x32xf32>
    %94 = arith.mulf %89, %93 : vector<2x32xf32>
    %cst_35 = arith.constant 0.000000e+00 : f32
    %95 = vector.broadcast %cst_35 : f32 to vector<2x32xf32>
    %96 = arith.maximumf %94, %95 : vector<2x32xf32>
    %c0_36 = arith.constant 0 : index
    %97 = arith.index_cast %73 : i32 to index
    %c0_37 = arith.constant 0 : index
    %c0_38 = arith.constant 0 : index
    %98 = vector.load %arg4[%c0_36, %97, %c0_37, %c0_38] : memref<1x4x2x32xf32, #tpu.memory_space<vmem>>, vector<1x1x2x32xf32>
    %99 = vector.shape_cast %98 : vector<1x1x2x32xf32> to vector<2x32xf32>
    %100 = vector.shape_cast %96 : vector<2x32xf32> to vector<1x1x2x32xf32>
    tpu.vector_store %arg4[%c0_36, %97, %c0_37, %c0_38], %100 {strides = array<i32>} : memref<1x4x2x32xf32, #tpu.memory_space<vmem>>, vector<1x1x2x32xf32>,
    %c3_i32_39 = arith.constant 3 : i32
    %c2_i32_40 = arith.constant 2 : i32
    %101 = arith.muli %c2_i32_40, %c3_i32_39 : i32
    %c3_i32_41 = arith.constant 3 : i32
    %102 = arith.subi %c3_i32_41, %101 : i32
    %103 = arith.muli %arg0, %102 : i32
    %104 = arith.addi %c3_i32_39, %103 : i32
    %c0_42 = arith.constant 0 : index
    %105 = arith.index_cast %104 : i32 to index
    %c0_43 = arith.constant 0 : index
    %c0_44 = arith.constant 0 : index
    %106 = vector.load %arg2[%c0_42, %105, %c0_43, %c0_44] : memref<1x4x2x128xf32, #tpu.memory_space<vmem>>, vector<1x1x2x128xf32>
    %107 = vector.shape_cast %106 : vector<1x1x2x128xf32> to vector<2x128xf32>
    %108 = arith.truncf %94 : vector<2x32xf32> to vector<2x32xbf16>
    %cst_45 = arith.constant dense<0.000000e+00> : vector<2x128xf32>
    %109 = tpu.matmul %108, %5, %cst_45 {dimension_numbers = #tpu.dot_dimension_numbers<[1], [0], [0], [1], [0, 0, 1, 1], [], []>} : vector<2x32xbf16>, vector<32x128xbf16>, vector<2x128xf32> -> vector<2x128xf32>
    %110 = arith.addf %107, %109 : vector<2x128xf32>
    %111 = arith.negf %110 : vector<2x128xf32>
    %112 = math.exp %111 : vector<2x128xf32>
    %cst_46 = arith.constant 1.000000e+00 : f32
    %113 = vector.broadcast %cst_46 : f32 to vector<2x128xf32>
    %114 = arith.addf %113, %112 : vector<2x128xf32>
    %115 = arith.divf %113, %114 : vector<2x128xf32>
    %116 = math.tanh %110 : vector<2x128xf32>
    %117 = vector.extract_strided_slice %115 {offsets = [0, 0], sizes = [2, 32], strides = [1, 1]} : vector<2x128xf32> to vector<2x32xf32>
    %118 = vector.extract_strided_slice %115 {offsets = [0, 32], sizes = [2, 32], strides = [1, 1]} : vector<2x128xf32> to vector<2x32xf32>
    %119 = vector.extract_strided_slice %116 {offsets = [0, 64], sizes = [2, 32], strides = [1, 1]} : vector<2x128xf32> to vector<2x32xf32>
    %120 = vector.extract_strided_slice %115 {offsets = [0, 96], sizes = [2, 32], strides = [1, 1]} : vector<2x128xf32> to vector<2x32xf32>
    %121 = arith.mulf %118, %92 : vector<2x32xf32>
    %122 = arith.mulf %117, %119 : vector<2x32xf32>
    %123 = arith.addf %121, %122 : vector<2x32xf32>
    %124 = math.tanh %123 : vector<2x32xf32>
    %125 = arith.mulf %120, %124 : vector<2x32xf32>
    %cst_47 = arith.constant 0.000000e+00 : f32
    %126 = vector.broadcast %cst_47 : f32 to vector<2x32xf32>
    %127 = arith.maximumf %125, %126 : vector<2x32xf32>
    %c0_48 = arith.constant 0 : index
    %128 = arith.index_cast %104 : i32 to index
    %c0_49 = arith.constant 0 : index
    %c0_50 = arith.constant 0 : index
    %129 = vector.load %arg4[%c0_48, %128, %c0_49, %c0_50] : memref<1x4x2x32xf32, #tpu.memory_space<vmem>>, vector<1x1x2x32xf32>
    %130 = vector.shape_cast %129 : vector<1x1x2x32xf32> to vector<2x32xf32>
    %131 = vector.shape_cast %127 : vector<2x32xf32> to vector<1x1x2x32xf32>
    tpu.vector_store %arg4[%c0_48, %128, %c0_49, %c0_50], %131 {strides = array<i32>} : memref<1x4x2x32xf32, #tpu.memory_space<vmem>>, vector<1x1x2x32xf32>,
    %c4_i32 = arith.constant 4 : i32
    %c0_51 = arith.constant 0 : index
    %c0_52 = arith.constant 0 : index
    %132 = vector.load %arg5[%c0_51, %c0_52] : memref<2x32xf32, #tpu.memory_space<vmem>>, vector<2x32xf32>
    tpu.vector_store %arg5[%c0_51, %c0_52], %125 {strides = array<i32>} : memref<2x32xf32, #tpu.memory_space<vmem>>, vector<2x32xf32>,
    %c0_53 = arith.constant 0 : index
    %c0_54 = arith.constant 0 : index
    %133 = vector.load %arg6[%c0_53, %c0_54] : memref<2x32xf32, #tpu.memory_space<vmem>>, vector<2x32xf32>
    tpu.vector_store %arg6[%c0_53, %c0_54], %123 {strides = array<i32>} : memref<2x32xf32, #tpu.memory_space<vmem>>, vector<2x32xf32>,
    return
  }
  func.func @transform_0(%arg0: i32, %arg1: i32) -> (i32, i32, i32, i32) {
    %c2_i32 = arith.constant 2 : i32
    %0 = arith.muli %c2_i32, %arg1 : i32
    %c1_i32 = arith.constant 1 : i32
    %1 = arith.subi %c1_i32, %0 : i32
    %2 = arith.muli %arg0, %1 : i32
    %3 = arith.addi %arg1, %2 : i32
    %c0_i32 = arith.constant 0 : i32
    %c0_i32_0 = arith.constant 0 : i32
    %c0_i32_1 = arith.constant 0 : i32
    return %arg0, %3, %c0_i32, %c0_i32_0 : i32, i32, i32, i32
  }
  func.func @transform_1(%arg0: i32, %arg1: i32) -> (i32, i32, i32) {
    %c0_i32 = arith.constant 0 : i32
    %c0_i32_0 = arith.constant 0 : i32
    %c0_i32_1 = arith.constant 0 : i32
    return %arg0, %c0_i32, %c0_i32_0 : i32, i32, i32
  }
  func.func @transform_2(%arg0: i32, %arg1: i32) -> (i32, i32, i32, i32) {
    %c2_i32 = arith.constant 2 : i32
    %0 = arith.muli %c2_i32, %arg1 : i32
    %c1_i32 = arith.constant 1 : i32
    %1 = arith.subi %c1_i32, %0 : i32
    %2 = arith.muli %arg0, %1 : i32
    %3 = arith.addi %arg1, %2 : i32
    %c0_i32 = arith.constant 0 : i32
    %c0_i32_0 = arith.constant 0 : i32
    %c0_i32_1 = arith.constant 0 : i32
    return %arg0, %3, %c0_i32, %c0_i32_0 : i32, i32, i32, i32
  }
}

</mosaic_0001>

<bundles_post_ra>
// kernel: bilstm_forward.2
= control target key start
LH: loop header
LB: loop body
LE: loop exit
PB: predicated region body
PF: predicated region fallthrough
CT: control target
= control target key end

     0   :  { %s965_s9 = smov 0   ;;  %s967_s10 = smov 0   ;;  %s1117_s0 = inlined_call_operand.vmem [shape: f32[2,8,2,128], index: 0, kind: input, shape index: {}]   ;;  %s1118_s1 = inlined_call_operand.vmem [shape: f32[2,32,128], index: 1, kind: input, shape index: {}]   ;;  %s1119_s2 = inlined_call_operand.vmem [shape: f32[2,8,2,32], index: 2, kind: output, shape index: {}]  }
   0x1   :  { %s969_s11 = smov 0   ;;  %s971_s12 = smov 0  }
   0x2   :  { %s973_s13 = smov 0  }
   0x3 LB: > { %s21_s14 = sadd.s32 1, %s934_s11  ;;  %s24_s15 = sadd.s32 1, %s938_s12  ;;  %s942_s13 = sphi %s973_s13, %s12_s13   ;;  %s938_s12 = sphi %s971_s12, %s1123_s12   ;;  %s934_s11 = sphi %s969_s11, %s1122_s11   ;;  %s930_s10 = sphi %s967_s10, %s1121_s10   ;;  %s926_s9 = sphi %s965_s9, %s1120_s9  }
   0x4   : > { %p22_p0 = scmp.ge.s32.totalorder %s21_s14, 2  ;;  %p749_p1 = scmp.ge.s32.totalorder %s942_s13, 1 }
   0x5   : > { %p167_p2 = scmp.lt.s32.totalorder %s942_s13, 5 }
   0x6   : > { %s1125_s14 = smov (%p22_p0, %s21_s14), 0  ;;  %s1127_s15 = smov (!%p22_p0, %s24_s15), %s938_s12 }
   0x7   : > { %p168_p3 = pnand %p749_p1, %p167_p2  ;;  %p26_p4 = scmp.ge.s32.totalorder %s1127_s15, 2 }
   0x8   : > { %s750_s16 = sshll.u32 (!%p168_p3), %s926_s9, 1  ;;  %p215_p5 = scmp.lt.s32.totalorder (!%p168_p3), %s930_s10, 1 }
   0x9   : > { %s1129_s15 = smov (%p26_p4, %s1127_s15), 0  ;;  %171 = sbr.rel (%p168_p3) target bundleno = 2849 (0xb21), region = 28 }
   0xa   : > { %s211_s17 = ssub.s32 (!%p168_p3), 1, %s750_s16  ;;  %p760_p7 = scmp.ne.s32.totalorder (!%p168_p3), %s926_s9, 0 }
   0xb   : > { %s212_s18 = smul.u32 (!%p168_p3), %s930_s10, %s211_s17 }
   0xd   : > { %s213_s20 = sadd.s32 (!%p168_p3), %s926_s9, %s212_s18 }
   0xe   : > { %s751_s21 = sshll.u32 (!%p168_p3), %s213_s20, 2 }
   0xf   : > { %p217_p6 = scmp.lt.s32.totalorder (!%p168_p3), %s751_s21, 7 }
  0x10   : > { %s216_s19 = scalar_select %p215_p5, %s930_s10, 1 }
  0x11   : > { %s1131_s21 = smov (!%p217_p6, %s751_s21), 7  ;;  %255 = sbr.rel (%p760_p7) target bundleno = 24 (0x18), region = 32 }
  0x12   : > { %s781_s22 = sshll.u32 %s216_s19, 5  ;;  %s752_s23 = sshll.u32 %s216_s19, 3  ;;  %vm256_vm0 = vcmask (!%p760_p7), 254976   ;;  %v944_v0 = vmov (!%p760_p7), 0.0  }
  0x13   : > { %s232_s26 = scalar_lea.vmem %s1118_s1, %s781_s22  ;;  %s220_s27 = sadd.s32 %s752_s23, %s1131_s21  ;;  %257 = vst.msk [vmem:[#allocation2] sm:$0x3] (!%p760_p7), %vm256_vm0, %v944_v0  ;;  %258 = vst.msk [vmem:[#allocation3] sm:$0x3] (!%p760_p7), %vm256_vm0, %v944_v0 }
  0x14   : > { %s753_s28 = sshll.u32 %s220_s27, 1 }
  0x15   : > { %s1010_s3 = scalar_lea.vmem %s1117_s0, %s753_s28  ;;  %s1015_s6 = scalar_lea.vmem %s1119_s2, %s753_s28 }
  0x18 PF: > { %v259_v1 = vld [vmem:[%s232_s26] sm:$0xff]  ;;  %v260_v2 = vld [vmem:[%s232_s26 + $0x8] sm:$0xff]  ;;  %v261_v3 = vld [vmem:[%s232_s26 + $0x10] sm:$0xff]  ;;  %v945_v4 = vmov 0.0   ;;  %vm946_vm1 = vmmov 0   ;;  %vm272_vm2 = vcmask 261120  }
  0x19   : > { %794 = vmatprep.subr.bf16.mxu0 %v945_v4  ;;  %v263_v5 = vpack.c.bf16 %v260_v2, %v259_v1  ;;  %v262_v6 = vld [vmem:[%s232_s26 + $0x18] sm:$0xff]  ;;  %798 = vmatprep.mubr.msk.bf16.mxu0 %vm946_vm1, %v945_v4  ;;  %s761_s7 = smul.u32 6, %s930_s10  ;;  %s947_s9 = smov 64   ;;  %vm350_vm3 = vcmask 254976  }
  0x1a   : > { %802 = vmatprep.subr.bf16.mxu1 %v945_v4  ;;  %806 = vmatprep.mubr.msk.bf16.mxu1 %vm946_vm1, %v945_v4  ;;  %v264_v7 = vpack.c.bf16 %v262_v6, %v261_v3  ;;  %v265_v8 = vld [vmem:[#allocation2] sm:$0x3]  ;;  %v266_v17 = vld [vmem:[#allocation3] sm:$0x3]  ;;  %s948_s16 = smov 32   ;;  %s764_s17 = sshll.u32 %s930_s10, 1 }
  0x1b   : > { %795 = vmatpush3.bf16.msra.mxu0 %v263_v5  ;;  %803 = vmatpush3.bf16.msra.mxu1 %v263_v5  ;;  %v271_v9 = vpack.c.bf16 %v265_v8, %v265_v8  ;;  %s269_s8 = scalar_lea.vmem %s1010_s3, %s761_s7  ;;  %s678_s18 = scalar_lea.vmem %s1010_s3, %s764_s17 }
  0x1c   : > { %796 = vmatprep.subr.bf16.mxu0 %v945_v4  ;;  %804 = vmatprep.subr.bf16.mxu1 %v945_v4  ;;  %v270_v10 = vld [vmem:[%s269_s8] sm:$0x3]  ;;  %v765_v33 = vld [vmem:[%s678_s18 + $0x2] sm:$0x3]  ;;  %s434_s19 = ssub.s32 2, %s930_s10  ;;  %s773_s22 = smul.u32 4294967290, %s930_s10 }
  0x1d   : > { %s1063_s20 = sshll.u32 %s434_s19, 1  ;;  %s349_s24 = scalar_lea.vmem %s1015_s6, %s761_s7 }
  0x1e   : > { %s436_s21 = scalar_lea.vmem %s1010_s3, %s1063_s20  ;;  %s689_s23 = scalar_lea.vmem %s1010_s3, %s773_s22 }
  0x1f   : > { %797 = vmatpush3.bf16.msra.mxu0 %v264_v7  ;;  %805 = vmatpush3.bf16.msra.mxu1 %v264_v7  ;;  %v437_v54 = vld [vmem:[%s436_s21] sm:$0x3]  ;;  %s949_s25 = smov 96   ;;  %s681_s26 = scalar_lea.vmem %s1015_s6, %s764_s17 }
  0x20   : > { %810 = vmatprep.subr.bf16.mxu0 %v945_v4  ;;  %818 = vmatprep.subr.bf16.mxu1 %v945_v4  ;;  %s514_s27 = scalar_lea.vmem %s1015_s6, %s1063_s20  ;;  %s693_s28 = scalar_lea.vmem %s1015_s6, %s773_s22 }
  0x22   : > { %799 = vmatmul.mubr.msk.bf16.vlgmr.msra.gmra.mrb[0].mxu0 %vm272_vm2, %v271_v9 }
  0x23   : > { %811 = vmatpush3.bf16.msra.mxu0 %v263_v5  ;;  %814 = vmatprep.mubr.msk.bf16.mxu0 %vm946_vm1, %v945_v4 }
  0x24   : > { %812 = vmatprep.subr.bf16.mxu0 %v945_v4 }
  0x27   : > { %813 = vmatpush3.bf16.msra.mxu0 %v264_v7 }
  0xf5   : > { %v310_v11 = vpop.f32.mrb[0].mxu0 }
  0xf6   : > { %v316_v12 = vadd.f32 %v310_v11, %v270_v10  ;;  %v800_v13 = vpop.f32.mrb[1].mxu0  ;;  %v774_v11 = vld [vmem:[%s689_s23 + $0x6] sm:$0x3] }
  0xf7   : > { %v313_v14 = vpop.f32.mrb[2].mxu0 }
  0xf8   : > { %872 = vtanh.f32 %v316_v12  ;;  %v801_v15 = vpop.f32.mrb[3].mxu0  ;;  %v763_v18 = vmul.f32 -1.442695, %v316_v12 }
  0xfa   : > { %874 = vpow2.f32 %v763_v18 }
 0x102   : > { %v873_v16 = vpop.eup %872 }
 0x103   : > { %330 = vrot.lane.b32.xlu0 %v873_v16, %s947_s9 }
 0x104   : > { %v875_v19 = vpop.eup %874 }
 0x105   : > { %v320_v20 = vadd.f32 1.0, %v875_v19 }
 0x107   : > { %325 = vrot.lane.b32.xlu0 %v266_v17, %s948_s16  ;;  %876 = vrcp.f32 %v320_v20 }
 0x111   : > { %v877_v21 = vpop.eup %876 }
 0x175   : > { %v331_v22 = vpop.permute.xlu0 %330 }
 0x176   : > { %v333_v23 = vmul.f32 %v877_v21, %v331_v22 }
 0x178   : > { %335 = vrot.lane.b32.xlu1 %v333_v23, %s948_s16 }
 0x179   : > { %v326_v24 = vpop.permute.xlu0 %325 }
 0x17a   : > { %v328_v25 = vmul.f32 %v877_v21, %v326_v24 }
 0x1ea   : > { %v336_v26 = vpop.permute.xlu1 %335 }
 0x1eb   : > { %v338_v27 = vadd.f32 %v336_v26, %v328_v25 }
 0x1ed   : > { %878 = vtanh.f32 %v338_v27 }
 0x1f7   : > { %v879_v28 = vpop.eup %878 }
 0x1f8   : > { %341 = vrot.lane.b32.xlu1 %v879_v28, %s947_s9 }
 0x26a   : > { %v342_v29 = vpop.permute.xlu1 %341 }
 0x26b   : > { %v1040_v30 = vmul.f32 %v877_v21, %v342_v29 }
 0x26d   : > { %v356_v31 = vpack.c.bf16 %v1040_v30, %v1040_v30 }
 0x26f   : > { %358 = vrot.lane.b32.xlu0 %v356_v31, %s948_s16 }
 0x2e1   : > { %v359_v32 = vpop.permute.xlu0 %358 }
 0x2e2   : > { %807 = vmatmul.mubr.msk.bf16.vlgmr.msra.gmra.mrb[0].mxu1 %vm272_vm2, %v359_v32 }
 0x2e3   : > { %819 = vmatpush3.bf16.msra.mxu1 %v263_v5  ;;  %822 = vmatprep.mubr.msk.bf16.mxu1 %vm946_vm1, %v945_v4 }
 0x2e4   : > { %820 = vmatprep.subr.bf16.mxu1 %v945_v4 }
 0x2e7   : > { %821 = vmatpush3.bf16.msra.mxu1 %v264_v7 }
 0x3b5   : > { %v397_v34 = vpop.f32.mrb[0].mxu1 }
 0x3b6   : > { %v403_v35 = vadd.f32 %v765_v33, %v397_v34  ;;  %v808_v36 = vpop.f32.mrb[1].mxu1 }
 0x3b7   : > { %v400_v37 = vpop.f32.mrb[2].mxu1 }
 0x3b8   : > { %880 = vtanh.f32 %v403_v35  ;;  %v809_v38 = vpop.f32.mrb[3].mxu1  ;;  %v767_v40 = vmul.f32 -1.442695, %v403_v35 }
 0x3ba   : > { %882 = vpow2.f32 %v767_v40 }
 0x3c2   : > { %v881_v39 = vpop.eup %880 }
 0x3c3   : > { %413 = vrot.lane.b32.xlu1 %v881_v39, %s947_s9 }
 0x3c4   : > { %v883_v41 = vpop.eup %882 }
 0x3c5   : > { %v407_v42 = vadd.f32 1.0, %v883_v41 }
 0x3c7   : > { %884 = vrcp.f32 %v407_v42 }
 0x3d1   : > { %v885_v43 = vpop.eup %884 }
 0x3d2   : > { %v411_v46 = vmul.f32 %v885_v43, %v338_v27 }
 0x435   : > { %v414_v44 = vpop.permute.xlu1 %413 }
 0x436   : > { %v416_v45 = vmul.f32 %v885_v43, %v414_v44 }
 0x438   : > { %418 = vrot.lane.b32.xlu0 %v416_v45, %s948_s16 }
 0x4aa   : > { %v419_v47 = vpop.permute.xlu0 %418 }
 0x4ab   : > { %v421_v48 = vadd.f32 %v419_v47, %v411_v46 }
 0x4ad   : > { %886 = vtanh.f32 %v421_v48 }
 0x4b7   : > { %v887_v49 = vpop.eup %886 }
 0x4b8   : > { %424 = vrot.lane.b32.xlu1 %v887_v49, %s947_s9 }
 0x52a   : > { %v425_v50 = vpop.permute.xlu1 %424 }
 0x52b   : > { %v1056_v51 = vmul.f32 %v885_v43, %v425_v50 }
 0x52d   : > { %v438_v52 = vpack.c.bf16 %v1056_v51, %v1056_v51 }
 0x52f   : > { %440 = vrot.lane.b32.xlu0 %v438_v52, %s948_s16 }
 0x5a1   : > { %v441_v53 = vpop.permute.xlu0 %440 }
 0x5a2   : > { %815 = vmatmul.mubr.msk.bf16.vlgmr.msra.gmra.mrb[4].mxu0 %vm272_vm2, %v441_v53 }
 0x675   : > { %v479_v55 = vpop.f32.mrb[4].mxu0 }
 0x676   : > { %v485_v56 = vadd.f32 %v479_v55, %v437_v54  ;;  %v816_v57 = vpop.f32.mrb[5].mxu0 }
 0x677   : > { %v482_v58 = vpop.f32.mrb[6].mxu0 }
 0x678   : > { %888 = vtanh.f32 %v485_v56  ;;  %v817_v59 = vpop.f32.mrb[7].mxu0  ;;  %v772_v61 = vmul.f32 -1.442695, %v485_v56 }
 0x67a   : > { %890 = vpow2.f32 %v772_v61 }
 0x682   : > { %v889_v60 = vpop.eup %888 }
 0x683   : > { %495 = vrot.lane.b32.xlu1 %v889_v60, %s947_s9 }
 0x684   : > { %v891_v62 = vpop.eup %890 }
 0x685   : > { %v489_v63 = vadd.f32 1.0, %v891_v62 }
 0x687   : > { %892 = vrcp.f32 %v489_v63 }
 0x691   : > { %v893_v0 = vpop.eup %892 }
 0x692   : > { %v493_v3 = vmul.f32 %v893_v0, %v421_v48 }
 0x6f5   : > { %v496_v1 = vpop.permute.xlu1 %495 }
 0x6f6   : > { %v498_v2 = vmul.f32 %v893_v0, %v496_v1 }
 0x6f8   : > { %500 = vrot.lane.b32.xlu0 %v498_v2, %s948_s16 }
 0x76a   : > { %v501_v4 = vpop.permute.xlu0 %500 }
 0x76b   : > { %v503_v5 = vadd.f32 %v501_v4, %v493_v3 }
 0x76d   : > { %894 = vtanh.f32 %v503_v5 }
 0x777   : > { %v895_v6 = vpop.eup %894 }
 0x778   : > { %506 = vrot.lane.b32.xlu1 %v895_v6, %s947_s9 }
 0x7ea   : > { %v507_v7 = vpop.permute.xlu1 %506 }
 0x7eb   : > { %v509_v8 = vmul.f32 %v893_v0, %v507_v7 }
 0x7ed   : > { %v521_v9 = vpack.c.bf16 %v509_v8, %v509_v8 }
 0x7ef   : > { %523 = vrot.lane.b32.xlu0 %v521_v9, %s948_s16 }
 0x861   : > { %v524_v10 = vpop.permute.xlu0 %523 }
 0x862   : > { %823 = vmatmul.mubr.msk.bf16.vlgmr.msra.gmra.mrb[4].mxu1 %vm272_vm2, %v524_v10 }
 0x935   : > { %v562_v12 = vpop.f32.mrb[4].mxu1 }
 0x936   : > { %v568_v13 = vadd.f32 %v774_v11, %v562_v12  ;;  %v824_v14 = vpop.f32.mrb[5].mxu1 }
 0x937   : > { %v565_v15 = vpop.f32.mrb[6].mxu1 }
 0x938   : > { %896 = vtanh.f32 %v568_v13  ;;  %v825_v16 = vpop.f32.mrb[7].mxu1  ;;  %v776_v18 = vmul.f32 -1.442695, %v568_v13 }
 0x93a   : > { %898 = vpow2.f32 %v776_v18 }
 0x942   : > { %v897_v17 = vpop.eup %896 }
 0x943   : > { %578 = vrot.lane.b32.xlu1 %v897_v17, %s947_s9 }
 0x944   : > { %v899_v19 = vpop.eup %898 }
 0x945   : > { %v572_v20 = vadd.f32 1.0, %v899_v19 }
 0x947   : > { %900 = vrcp.f32 %v572_v20 }
 0x951   : > { %v901_v21 = vpop.eup %900 }
 0x952   : > { %v576_v24 = vmul.f32 %v901_v21, %v503_v5 }
 0x9b5   : > { %v579_v22 = vpop.permute.xlu1 %578 }
 0x9b6   : > { %v581_v23 = vmul.f32 %v901_v21, %v579_v22 }
 0x9b8   : > { %583 = vrot.lane.b32.xlu0 %v581_v23, %s948_s16 }
 0x9bc   : > { %346 = vrot.lane.b32.xlu0 %v1040_v30, %s948_s16 }
 0x9c0   : > { %511 = vrot.lane.b32.xlu0 %v509_v8, %s948_s16 }
 0xa2a   : > { %v584_v25 = vpop.permute.xlu0 %583 }
 0xa2b   : > { %v586_v26 = vadd.f32 %v584_v25, %v576_v24 }
 0xa2d   : > { %902 = vtanh.f32 %v586_v26  ;;  %601 = vrot.lane.b32.xlu0 %v586_v26, %s949_s25 }
 0xa2e   : > { %v347_v27 = vpop.permute.xlu0 %346 }
 0xa2f   : > { %351 = vst.msk [vmem:[%s349_s24] sm:$0x3] %vm350_vm3, %v347_v27 }
 0xa32   : > { %v512_v29 = vpop.permute.xlu0 %511 }
 0xa37   : > { %v903_v28 = vpop.eup %902 }
 0xa38   : > { %589 = vrot.lane.b32.xlu1 %v903_v28, %s947_s9 }
 0xa3c   : > { %429 = vrot.lane.b32.xlu1 %v1056_v51, %s948_s16 }
 0xa9f   : > { %v602_v30 = vpop.permute.xlu0 %601 }
 0xaa0   : > { %604 = vst.msk [vmem:[#allocation3] sm:$0x3] %vm350_vm3, %v602_v30 }
 0xaaa   : > { %v590_v31 = vpop.permute.xlu1 %589 }
 0xaab   : > { %v592_v32 = vmul.f32 %v901_v21, %v590_v31 }
 0xaad   : > { %594 = vrot.lane.b32.xlu1 %v592_v32, %s948_s16 }
 0xaae   : > { %v430_v33 = vpop.permute.xlu1 %429 }
 0xaaf   : > { %769 = vst.msk [vmem:[%s681_s26 + $0x2] sm:$0x3] %vm350_vm3, %v430_v33 }
 0xab0   : > { %515 = vst.msk [vmem:[%s514_s27] sm:$0x3] %vm350_vm3, %v512_v29 }
 0xb1f   : > { %v595_v34 = vpop.permute.xlu1 %594 }
 0xb20   : > { %778 = vst.msk [vmem:[%s693_s28 + $0x6] sm:$0x3] %vm350_vm3, %v595_v34  ;;  %599 = vst.msk [vmem:[#allocation2] sm:$0x3] %vm350_vm3, %v595_v34 }
 0xb21 PF: > { %s12_s13 = sadd.s32 1, %s942_s13   ;;  %s1120_s9 = smov %s934_s11 }
 0xb22   : > { %p9_p8 = scmp.ge.s32.totalorder %s12_s13, 6   ;;  %s1121_s10 = smov %s938_s12 }
 0xb23   : > { %s1122_s11 = smov %s1125_s14  ;;  %s1123_s12 = smov %s1129_s15 }
 0xb24   :  { %11 = sbr.rel (!%p9_p8) target bundleno = 3 (0x3), region = 73 }

// kernel: bilstm_forward.3
= control target key start
LH: loop header
LB: loop body
LE: loop exit
PB: predicated region body
PF: predicated region fallthrough
CT: control target
= control target key end

     0   :  { %s973_s9 = smov 0   ;;  %s975_s10 = smov 0   ;;  %s1126_s0 = inlined_call_operand.vmem [shape: f32[2,8,2,128], index: 0, kind: input, shape index: {}]   ;;  %s1127_s1 = inlined_call_operand.vmem [shape: f32[2,32,128], index: 1, kind: input, shape index: {}]   ;;  %s1128_s2 = inlined_call_operand.vmem [shape: f32[2,8,2,32], index: 2, kind: output, shape index: {}]  }
   0x1   :  { %s977_s11 = smov 0   ;;  %s979_s12 = smov 0  }
   0x2   :  { %s981_s13 = smov 0  }
   0x3 LB: > { %s21_s14 = sadd.s32 1, %s942_s11  ;;  %s24_s15 = sadd.s32 1, %s946_s12  ;;  %s950_s13 = sphi %s981_s13, %s12_s13   ;;  %s946_s12 = sphi %s979_s12, %s1132_s12   ;;  %s942_s11 = sphi %s977_s11, %s1131_s11   ;;  %s938_s10 = sphi %s975_s10, %s1130_s10   ;;  %s934_s9 = sphi %s973_s9, %s1129_s9  }
   0x4   : > { %p22_p0 = scmp.ge.s32.totalorder %s21_s14, 2  ;;  %p757_p1 = scmp.ge.s32.totalorder %s950_s13, 1 }
   0x5   : > { %p167_p2 = scmp.lt.s32.totalorder %s950_s13, 5 }
   0x6   : > { %s1134_s14 = smov (%p22_p0, %s21_s14), 0  ;;  %s1136_s15 = smov (!%p22_p0, %s24_s15), %s946_s12 }
   0x7   : > { %p168_p3 = pnand %p757_p1, %p167_p2  ;;  %p26_p4 = scmp.ge.s32.totalorder %s1136_s15, 2 }
   0x8   : > { %s758_s16 = sshll.u32 (!%p168_p3), %s934_s9, 1  ;;  %p215_p5 = scmp.lt.s32.totalorder (!%p168_p3), %s938_s10, 1 }
   0x9   : > { %s1138_s15 = smov (%p26_p4, %s1136_s15), 0  ;;  %171 = sbr.rel (%p168_p3) target bundleno = 2855 (0xb27), region = 28 }
   0xa   : > { %s211_s17 = ssub.s32 (!%p168_p3), 1, %s758_s16  ;;  %p768_p7 = scmp.ne.s32.totalorder (!%p168_p3), %s934_s9, 0 }
   0xb   : > { %s212_s18 = smul.u32 (!%p168_p3), %s938_s10, %s211_s17 }
   0xd   : > { %s213_s20 = sadd.s32 (!%p168_p3), %s934_s9, %s212_s18 }
   0xe   : > { %s759_s21 = sshll.u32 (!%p168_p3), %s213_s20, 2 }
   0xf   : > { %p217_p6 = scmp.lt.s32.totalorder (!%p168_p3), %s759_s21, 7 }
  0x10   : > { %s216_s19 = scalar_select %p215_p5, %s938_s10, 1 }
  0x11   : > { %s1140_s21 = smov (!%p217_p6, %s759_s21), 7  ;;  %255 = sbr.rel (%p768_p7) target bundleno = 24 (0x18), region = 32 }
  0x12   : > { %s789_s22 = sshll.u32 %s216_s19, 5  ;;  %s760_s23 = sshll.u32 %s216_s19, 3  ;;  %vm256_vm0 = vcmask (!%p768_p7), 254976   ;;  %v952_v0 = vmov (!%p768_p7), 0.0  }
  0x13   : > { %s232_s26 = scalar_lea.vmem %s1127_s1, %s789_s22  ;;  %s220_s27 = sadd.s32 %s760_s23, %s1140_s21  ;;  %257 = vst.msk [vmem:[#allocation2] sm:$0x3] (!%p768_p7), %vm256_vm0, %v952_v0  ;;  %258 = vst.msk [vmem:[#allocation3] sm:$0x3] (!%p768_p7), %vm256_vm0, %v952_v0 }
  0x14   : > { %s761_s28 = sshll.u32 %s220_s27, 1 }
  0x15   : > { %s1018_s3 = scalar_lea.vmem %s1126_s0, %s761_s28  ;;  %s1023_s6 = scalar_lea.vmem %s1128_s2, %s761_s28 }
  0x18 PF: > { %v259_v1 = vld [vmem:[%s232_s26] sm:$0xff]  ;;  %v260_v2 = vld [vmem:[%s232_s26 + $0x8] sm:$0xff]  ;;  %v261_v3 = vld [vmem:[%s232_s26 + $0x10] sm:$0xff]  ;;  %v953_v4 = vmov 0.0   ;;  %vm954_vm1 = vmmov 0   ;;  %vm272_vm2 = vcmask 261120  }
  0x19   : > { %802 = vmatprep.subr.bf16.mxu0 %v953_v4  ;;  %v263_v5 = vpack.c.bf16 %v260_v2, %v259_v1  ;;  %v262_v6 = vld [vmem:[%s232_s26 + $0x18] sm:$0xff]  ;;  %806 = vmatprep.mubr.msk.bf16.mxu0 %vm954_vm1, %v953_v4  ;;  %s769_s7 = smul.u32 6, %s938_s10  ;;  %s955_s9 = smov 64   ;;  %vm351_vm3 = vcmask 254976  }
  0x1a   : > { %810 = vmatprep.subr.bf16.mxu1 %v953_v4  ;;  %814 = vmatprep.mubr.msk.bf16.mxu1 %vm954_vm1, %v953_v4  ;;  %v264_v7 = vpack.c.bf16 %v262_v6, %v261_v3  ;;  %v265_v8 = vld [vmem:[#allocation2] sm:$0x3]  ;;  %v266_v17 = vld [vmem:[#allocation3] sm:$0x3]  ;;  %s956_s16 = smov 32   ;;  %s772_s17 = sshll.u32 %s938_s10, 1 }
  0x1b   : > { %803 = vmatpush3.bf16.msra.mxu0 %v263_v5  ;;  %811 = vmatpush3.bf16.msra.mxu1 %v263_v5  ;;  %v271_v9 = vpack.c.bf16 %v265_v8, %v265_v8  ;;  %s269_s8 = scalar_lea.vmem %s1018_s3, %s769_s7  ;;  %s686_s18 = scalar_lea.vmem %s1018_s3, %s772_s17 }
  0x1c   : > { %804 = vmatprep.subr.bf16.mxu0 %v953_v4  ;;  %812 = vmatprep.subr.bf16.mxu1 %v953_v4  ;;  %v270_v10 = vld [vmem:[%s269_s8] sm:$0x3]  ;;  %v773_v33 = vld [vmem:[%s686_s18 + $0x2] sm:$0x3]  ;;  %s436_s19 = ssub.s32 2, %s938_s10  ;;  %s781_s22 = smul.u32 4294967290, %s938_s10 }
  0x1d   : > { %s1071_s20 = sshll.u32 %s436_s19, 1  ;;  %s350_s24 = scalar_lea.vmem %s1023_s6, %s769_s7 }
  0x1e   : > { %s438_s21 = scalar_lea.vmem %s1018_s3, %s1071_s20  ;;  %s697_s23 = scalar_lea.vmem %s1018_s3, %s781_s22 }
  0x1f   : > { %805 = vmatpush3.bf16.msra.mxu0 %v264_v7  ;;  %813 = vmatpush3.bf16.msra.mxu1 %v264_v7  ;;  %v439_v54 = vld [vmem:[%s438_s21] sm:$0x3]  ;;  %s689_s25 = scalar_lea.vmem %s1023_s6, %s772_s17  ;;  %s517_s26 = scalar_lea.vmem %s1023_s6, %s1071_s20 }
  0x20   : > { %818 = vmatprep.subr.bf16.mxu0 %v953_v4  ;;  %826 = vmatprep.subr.bf16.mxu1 %v953_v4  ;;  %s957_s27 = smov 96   ;;  %s701_s28 = scalar_lea.vmem %s1023_s6, %s781_s22 }
  0x22   : > { %807 = vmatmul.mubr.msk.bf16.vlgmr.msra.gmra.mrb[0].mxu0 %vm272_vm2, %v271_v9 }
  0x23   : > { %819 = vmatpush3.bf16.msra.mxu0 %v263_v5  ;;  %822 = vmatprep.mubr.msk.bf16.mxu0 %vm954_vm1, %v953_v4 }
  0x24   : > { %820 = vmatprep.subr.bf16.mxu0 %v953_v4 }
  0x27   : > { %821 = vmatpush3.bf16.msra.mxu0 %v264_v7 }
  0xf5   : > { %v310_v11 = vpop.f32.mrb[0].mxu0 }
  0xf6   : > { %v316_v12 = vadd.f32 %v310_v11, %v270_v10  ;;  %v808_v13 = vpop.f32.mrb[1].mxu0  ;;  %v782_v11 = vld [vmem:[%s697_s23 + $0x6] sm:$0x3] }
  0xf7   : > { %v313_v14 = vpop.f32.mrb[2].mxu0 }
  0xf8   : > { %880 = vtanh.f32 %v316_v12  ;;  %v809_v15 = vpop.f32.mrb[3].mxu0  ;;  %v771_v18 = vmul.f32 -1.442695, %v316_v12 }
  0xfa   : > { %882 = vpow2.f32 %v771_v18 }
 0x102   : > { %v881_v16 = vpop.eup %880 }
 0x103   : > { %330 = vrot.lane.b32.xlu0 %v881_v16, %s955_s9 }
 0x104   : > { %v883_v19 = vpop.eup %882 }
 0x105   : > { %v320_v20 = vadd.f32 1.0, %v883_v19 }
 0x107   : > { %325 = vrot.lane.b32.xlu0 %v266_v17, %s956_s16  ;;  %884 = vrcp.f32 %v320_v20 }
 0x111   : > { %v885_v21 = vpop.eup %884 }
 0x175   : > { %v331_v22 = vpop.permute.xlu0 %330 }
 0x176   : > { %v333_v23 = vmul.f32 %v885_v21, %v331_v22 }
 0x178   : > { %335 = vrot.lane.b32.xlu1 %v333_v23, %s956_s16 }
 0x179   : > { %v326_v24 = vpop.permute.xlu0 %325 }
 0x17a   : > { %v328_v25 = vmul.f32 %v885_v21, %v326_v24 }
 0x1ea   : > { %v336_v26 = vpop.permute.xlu1 %335 }
 0x1eb   : > { %v338_v27 = vadd.f32 %v336_v26, %v328_v25 }
 0x1ed   : > { %886 = vtanh.f32 %v338_v27 }
 0x1f7   : > { %v887_v28 = vpop.eup %886 }
 0x1f8   : > { %341 = vrot.lane.b32.xlu1 %v887_v28, %s955_s9 }
 0x26a   : > { %v342_v29 = vpop.permute.xlu1 %341 }
 0x26b   : > { %v1048_v30 = vmul.f32 %v885_v21, %v342_v29 }
 0x26d   : > { %v357_v31 = vpack.c.bf16 %v1048_v30, %v1048_v30  ;;  %v345_v24 = vmax.f32 %v1048_v30, 0.0 }
 0x26f   : > { %359 = vrot.lane.b32.xlu0 %v357_v31, %s956_s16 }
 0x2e1   : > { %v360_v32 = vpop.permute.xlu0 %359 }
 0x2e2   : > { %815 = vmatmul.mubr.msk.bf16.vlgmr.msra.gmra.mrb[0].mxu1 %vm272_vm2, %v360_v32 }
 0x2e3   : > { %827 = vmatpush3.bf16.msra.mxu1 %v263_v5  ;;  %830 = vmatprep.mubr.msk.bf16.mxu1 %vm954_vm1, %v953_v4 }
 0x2e4   : > { %828 = vmatprep.subr.bf16.mxu1 %v953_v4 }
 0x2e7   : > { %829 = vmatpush3.bf16.msra.mxu1 %v264_v7 }
 0x3b5   : > { %v398_v34 = vpop.f32.mrb[0].mxu1 }
 0x3b6   : > { %v404_v35 = vadd.f32 %v773_v33, %v398_v34  ;;  %v816_v36 = vpop.f32.mrb[1].mxu1 }
 0x3b7   : > { %v401_v37 = vpop.f32.mrb[2].mxu1 }
 0x3b8   : > { %888 = vtanh.f32 %v404_v35  ;;  %v817_v38 = vpop.f32.mrb[3].mxu1  ;;  %v775_v40 = vmul.f32 -1.442695, %v404_v35 }
 0x3ba   : > { %890 = vpow2.f32 %v775_v40 }
 0x3c2   : > { %v889_v39 = vpop.eup %888 }
 0x3c3   : > { %414 = vrot.lane.b32.xlu1 %v889_v39, %s955_s9 }
 0x3c4   : > { %v891_v41 = vpop.eup %890 }
 0x3c5   : > { %v408_v42 = vadd.f32 1.0, %v891_v41 }
 0x3c7   : > { %892 = vrcp.f32 %v408_v42 }
 0x3d1   : > { %v893_v43 = vpop.eup %892 }
 0x3d2   : > { %v412_v46 = vmul.f32 %v893_v43, %v338_v27 }
 0x435   : > { %v415_v44 = vpop.permute.xlu1 %414 }
 0x436   : > { %v417_v45 = vmul.f32 %v893_v43, %v415_v44 }
 0x438   : > { %419 = vrot.lane.b32.xlu0 %v417_v45, %s956_s16 }
 0x4aa   : > { %v420_v47 = vpop.permute.xlu0 %419 }
 0x4ab   : > { %v422_v48 = vadd.f32 %v420_v47, %v412_v46 }
 0x4ad   : > { %894 = vtanh.f32 %v422_v48 }
 0x4b7   : > { %v895_v49 = vpop.eup %894 }
 0x4b8   : > { %425 = vrot.lane.b32.xlu1 %v895_v49, %s955_s9 }
 0x52a   : > { %v426_v50 = vpop.permute.xlu1 %425 }
 0x52b   : > { %v1064_v51 = vmul.f32 %v893_v43, %v426_v50 }
 0x52d   : > { %v440_v52 = vpack.c.bf16 %v1064_v51, %v1064_v51  ;;  %v429_v31 = vmax.f32 %v1064_v51, 0.0 }
 0x52f   : > { %442 = vrot.lane.b32.xlu0 %v440_v52, %s956_s16 }
 0x5a1   : > { %v443_v53 = vpop.permute.xlu0 %442 }
 0x5a2   : > { %823 = vmatmul.mubr.msk.bf16.vlgmr.msra.gmra.mrb[4].mxu0 %vm272_vm2, %v443_v53 }
 0x675   : > { %v481_v55 = vpop.f32.mrb[4].mxu0 }
 0x676   : > { %v487_v56 = vadd.f32 %v481_v55, %v439_v54  ;;  %v824_v57 = vpop.f32.mrb[5].mxu0 }
 0x677   : > { %v484_v58 = vpop.f32.mrb[6].mxu0 }
 0x678   : > { %896 = vtanh.f32 %v487_v56  ;;  %v825_v59 = vpop.f32.mrb[7].mxu0  ;;  %v780_v61 = vmul.f32 -1.442695, %v487_v56 }
 0x67a   : > { %898 = vpow2.f32 %v780_v61 }
 0x682   : > { %v897_v60 = vpop.eup %896 }
 0x683   : > { %497 = vrot.lane.b32.xlu1 %v897_v60, %s955_s9 }
 0x684   : > { %v899_v62 = vpop.eup %898 }
 0x685   : > { %v491_v63 = vadd.f32 1.0, %v899_v62 }
 0x687   : > { %900 = vrcp.f32 %v491_v63 }
 0x691   : > { %v901_v0 = vpop.eup %900 }
 0x692   : > { %v495_v3 = vmul.f32 %v901_v0, %v422_v48 }
 0x6f5   : > { %v498_v1 = vpop.permute.xlu1 %497 }
 0x6f6   : > { %v500_v2 = vmul.f32 %v901_v0, %v498_v1 }
 0x6f8   : > { %502 = vrot.lane.b32.xlu0 %v500_v2, %s956_s16 }
 0x76a   : > { %v503_v4 = vpop.permute.xlu0 %502 }
 0x76b   : > { %v505_v5 = vadd.f32 %v503_v4, %v495_v3 }
 0x76d   : > { %902 = vtanh.f32 %v505_v5 }
 0x777   : > { %v903_v6 = vpop.eup %902 }
 0x778   : > { %508 = vrot.lane.b32.xlu1 %v903_v6, %s955_s9 }
 0x7ea   : > { %v509_v7 = vpop.permute.xlu1 %508 }
 0x7eb   : > { %v511_v8 = vmul.f32 %v901_v0, %v509_v7 }
 0x7ed   : > { %v524_v9 = vpack.c.bf16 %v511_v8, %v511_v8  ;;  %v512_v25 = vmax.f32 %v511_v8, 0.0 }
 0x7ef   : > { %526 = vrot.lane.b32.xlu0 %v524_v9, %s956_s16 }
 0x861   : > { %v527_v10 = vpop.permute.xlu0 %526 }
 0x862   : > { %831 = vmatmul.mubr.msk.bf16.vlgmr.msra.gmra.mrb[4].mxu1 %vm272_vm2, %v527_v10 }
 0x935   : > { %v565_v12 = vpop.f32.mrb[4].mxu1 }
 0x936   : > { %v571_v13 = vadd.f32 %v782_v11, %v565_v12  ;;  %v832_v14 = vpop.f32.mrb[5].mxu1 }
 0x937   : > { %v568_v15 = vpop.f32.mrb[6].mxu1 }
 0x938   : > { %904 = vtanh.f32 %v571_v13  ;;  %v833_v16 = vpop.f32.mrb[7].mxu1  ;;  %v784_v18 = vmul.f32 -1.442695, %v571_v13 }
 0x93a   : > { %906 = vpow2.f32 %v784_v18 }
 0x942   : > { %v905_v17 = vpop.eup %904 }
 0x943   : > { %581 = vrot.lane.b32.xlu1 %v905_v17, %s955_s9 }
 0x944   : > { %v907_v19 = vpop.eup %906 }
 0x945   : > { %v575_v20 = vadd.f32 1.0, %v907_v19 }
 0x947   : > { %908 = vrcp.f32 %v575_v20 }
 0x951   : > { %v909_v21 = vpop.eup %908 }
 0x952   : > { %v579_v26 = vmul.f32 %v909_v21, %v505_v5 }
 0x9b5   : > { %v582_v22 = vpop.permute.xlu1 %581 }
 0x9b6   : > { %v584_v23 = vmul.f32 %v909_v21, %v582_v22 }
 0x9b8   : > { %586 = vrot.lane.b32.xlu0 %v584_v23, %s956_s16 }
 0x9bc   : > { %347 = vrot.lane.b32.xlu0 %v345_v24, %s956_s16 }
 0x9c0   : > { %514 = vrot.lane.b32.xlu0 %v512_v25, %s956_s16 }
 0xa2a   : > { %v587_v27 = vpop.permute.xlu0 %586 }
 0xa2b   : > { %v589_v28 = vadd.f32 %v587_v27, %v579_v26 }
 0xa2d   : > { %910 = vtanh.f32 %v589_v28 }
 0xa2e   : > { %v348_v29 = vpop.permute.xlu0 %347 }
 0xa2f   : > { %352 = vst.msk [vmem:[%s350_s24] sm:$0x3] %vm351_vm3, %v348_v29 }
 0xa32   : > { %v515_v36 = vpop.permute.xlu0 %514 }
 0xa37   : > { %v911_v30 = vpop.eup %910 }
 0xa38   : > { %592 = vrot.lane.b32.xlu1 %v911_v30, %s955_s9 }
 0xa3c   : > { %431 = vrot.lane.b32.xlu1 %v429_v31, %s956_s16 }
 0xaaa   : > { %v593_v32 = vpop.permute.xlu1 %592 }
 0xaab   : > { %v595_v33 = vmul.f32 %v909_v21, %v593_v32 }
 0xaad   : > { %v596_v34 = vmax.f32 %v595_v33, 0.0  ;;  %604 = vrot.lane.b32.xlu0 %v595_v33, %s956_s16 }
 0xaae   : > { %v432_v35 = vpop.permute.xlu1 %431 }
 0xaaf   : > { %777 = vst.msk [vmem:[%s689_s25 + $0x2] sm:$0x3] %vm351_vm3, %v432_v35  ;;  %598 = vrot.lane.b32.xlu1 %v596_v34, %s956_s16 }
 0xab0   : > { %518 = vst.msk [vmem:[%s517_s26] sm:$0x3] %vm351_vm3, %v515_v36 }
 0xab3   : > { %609 = vrot.lane.b32.xlu1 %v589_v28, %s957_s27 }
 0xb1f   : > { %v605_v37 = vpop.permute.xlu0 %604 }
 0xb20   : > { %607 = vst.msk [vmem:[#allocation2] sm:$0x3] %vm351_vm3, %v605_v37 }
 0xb21   : > { %v599_v38 = vpop.permute.xlu1 %598 }
 0xb22   : > { %786 = vst.msk [vmem:[%s701_s28 + $0x6] sm:$0x3] %vm351_vm3, %v599_v38 }
 0xb25   : > { %v610_v39 = vpop.permute.xlu1 %609 }
 0xb26   : > { %612 = vst.msk [vmem:[#allocation3] sm:$0x3] %vm351_vm3, %v610_v39 }
 0xb27 PF: > { %s12_s13 = sadd.s32 1, %s950_s13   ;;  %s1129_s9 = smov %s942_s11 }
 0xb28   : > { %p9_p8 = scmp.ge.s32.totalorder %s12_s13, 6   ;;  %s1130_s10 = smov %s946_s12 }
 0xb29   : > { %s1131_s11 = smov %s1134_s14  ;;  %s1132_s12 = smov %s1138_s15 }
 0xb2a   :  { %11 = sbr.rel (!%p9_p8) target bundleno = 3 (0x3), region = 73 }

</bundles_post_ra>
